<compile_context>
chip_gen: v6e
topology: v6e:2x2x1
jax: 0.10.0
libtpu: 0.0.40
codegen_flags: <defaults>
</compile_context>

<pallas_src>
import functools

import jax
import jax.numpy as jnp
from jax.experimental import pallas as pl
from jax.experimental.pallas import tpu as pltpu


IGNORE_INDEX = 0


def _ce_kernel(x_ref, t_ref, nll_out_ref, cnt_out_ref, nll_acc, cnt_acc, *,
               ignore_index, hw, tile_hw, tiles_per_split):
    """One (batch n, split s, HW-tile j) step.

    x_ref:       (1, C, T)      logits tile (native dtype), channels on sublanes.
    t_ref:       (1, 1, T)      integer target labels.
    nll_out_ref: (1, 1, 1, 128) per-(n,s) reduced sum of -log p[target].
    cnt_out_ref: (1, 1, 1, 128) per-(n,s) reduced count of valid pixels.
    nll_acc:     (1, 1, T) f32  VMEM scratch, per-lane partial nll sums.
    cnt_acc:     (1, 1, T) f32  VMEM scratch, per-lane partial valid counts.
    """
    s = pl.program_id(1)
    j = pl.program_id(2)

    @pl.when(j == 0)
    def _():
        nll_acc[...] = jnp.zeros_like(nll_acc)
        cnt_acc[...] = jnp.zeros_like(cnt_acc)

    x = x_ref[...].astype(jnp.float32)            # (1, C, T)
    t = t_ref[...].astype(jnp.int32)              # (1, 1, T)

    # Valid mask: not ignore_index AND inside the real (unpadded / unsplit) HW
    # range.  Overflow tiles introduced by the S-way split land entirely past
    # `hw` and are therefore fully masked here.
    lane = jax.lax.broadcasted_iota(jnp.int32, t.shape, dimension=2)
    jj = s * tiles_per_split + j
    pix = jj * tile_hw + lane
    valid = (t != ignore_index) & (pix < hw)      # (1, 1, T) bool

    # Numerically stable log-sum-exp over the channel (sublane) axis; xm is
    # computed once and reused for the target pick (no '+ m' add-back needed:
    # lse - picked_x == log(sum(exp(x - m))) - (picked_x - m)).
    m = jnp.max(x, axis=1, keepdims=True)                             # (1, 1, T)
    xm = x - m                                                        # (1, C, T)
    lse_term = jnp.log(jnp.sum(jnp.exp(xm), axis=1, keepdims=True))   # (1, 1, T)

    ch = jax.lax.broadcasted_iota(jnp.int32, x.shape, dimension=1)    # (1, C, T)
    picked = jnp.sum(jnp.where(ch == t, xm, 0.0), axis=1, keepdims=True)

    # Use select (not mul) so garbage lanes in a partial / overflow tile cannot
    # inject NaN into the accumulators.
    nll_acc[...] += jnp.where(valid, lse_term - picked, 0.0)
    cnt_acc[...] += valid.astype(jnp.float32)

    @pl.when(j == pl.num_programs(2) - 1)
    def _():
        nll_out_ref[...] = jnp.full(nll_out_ref.shape, jnp.sum(nll_acc[...]),
                                    dtype=jnp.float32)
        cnt_out_ref[...] = jnp.full(cnt_out_ref.shape, jnp.sum(cnt_acc[...]),
                                    dtype=jnp.float32)


def _pick_tile_hw(hw, c):
    """Lane count (multiple of 128) with a ~2 MiB f32 working block, capped so
    the sublane-padded targets / accumulators stay cheap."""
    t = ((2 * 1024 * 1024) // max(c * 4, 1)) // 128 * 128
    t = max(128, min(t, 64 * 1024))
    if t >= hw:
        return hw          # full HW axis in one block (always legal)
    return t


def _vmem_limit_bytes(c, tile_hw, itemsize):
    """Conservative VMEM budget: double-buffered logits + sublane-padded
    targets + in-kernel f32 temporaries + scratch accumulators."""
    est = (2 * c * tile_hw * itemsize       # logits, double-buffered
           + 2 * 8 * tile_hw * 4            # targets (8-sublane padded), x2
           + 3 * c * tile_hw * 4            # f32 intermediates (xm, exp, where)
           + 2 * 8 * tile_hw * 4            # nll/cnt VMEM scratch
           + (2 << 20))                     # misc headroom
    return min(max(32 << 20, int(est * 1.25)), 64 << 20)


def cross_entropy_loss_2d(logits_nchw, target_nhw, *, ignore_index=IGNORE_INDEX,
                          tile_hw=None):
    """Equivalent of CrossEntropyLoss2d.forward(input, target).

    logits_nchw: (N, C, H, W) float (any float dtype; cast to f32 in-kernel)
    target_nhw:  (N, H, W) int
    returns: scalar float32 mean NLL over pixels whose target != ignore_index
             (NaN if there are no valid pixels, matching PyTorch mean reduction).
    """
    N, C, H, W = logits_nchw.shape
    HW = H * W

    # Free reshapes only: no transpose, no pad, no extra HBM pass.
    x = logits_nchw.reshape(N, C, HW)
    t = target_nhw.reshape(N, 1, HW)
    if not jnp.issubdtype(t.dtype, jnp.integer):
        t = t.astype(jnp.int32)

    if tile_hw is None:
        tile_hw = _pick_tile_hw(HW, C)

    j_total = pl.cdiv(HW, tile_hw)
    # Split the HW-tile axis into S=2 parallel groups when possible so v7x's
    # two TensorCores have independent work even when N == 1.
    n_split = 2 if j_total >= 2 else 1
    j_per = pl.cdiv(j_total, n_split)
    grid = (N, n_split, j_per)

    def _x_map(n, s, j):
        return (n, 0, jnp.minimum(s * j_per + j, j_total - 1))

    def _t_map(n, s, j):
        return (n, 0, jnp.minimum(s * j_per + j, j_total - 1))

    def _out_map(n, s, j):
        return (n, s, 0, 0)

    kernel = functools.partial(_ce_kernel, ignore_index=ignore_index,
                               hw=HW, tile_hw=tile_hw, tiles_per_split=j_per)

    nll_out, cnt_out = pl.pallas_call(
        kernel,
        out_shape=(
            jax.ShapeDtypeStruct((N, n_split, 1, 128), jnp.float32),
            jax.ShapeDtypeStruct((N, n_split, 1, 128), jnp.float32),
        ),
        grid_spec=pltpu.PrefetchScalarGridSpec(
            num_scalar_prefetch=0,
            grid=grid,
            in_specs=[
                # logits: channels on sublanes (full C), pixels on lanes.
                pl.BlockSpec((1, C, tile_hw), _x_map),
                # targets: one integer row of pixels.
                pl.BlockSpec((1, 1, tile_hw), _t_map),
            ],
            out_specs=(
                # Tiny per-(n,s) lane-dense result blocks (written once).
                pl.BlockSpec((1, 1, 1, 128), _out_map),
                pl.BlockSpec((1, 1, 1, 128), _out_map),
            ),
            scratch_shapes=[
                pltpu.VMEM((1, 1, tile_hw), jnp.float32),
                pltpu.VMEM((1, 1, tile_hw), jnp.float32),
            ],
        ),
        compiler_params=pltpu.CompilerParams(
            dimension_semantics=("parallel", "parallel", "arbitrary"),
            vmem_limit_bytes=_vmem_limit_bytes(C, tile_hw, x.dtype.itemsize),
        ),
    )(x, t)

    # Tiny final reduction + mean over valid pixels in JAX (N*S scalars).
    total_nll = jnp.sum(nll_out[..., 0])
    total_cnt = jnp.sum(cnt_out[..., 0])
    return (total_nll / total_cnt).astype(jnp.float32)


def _reference(logits_nchw, target_nhw, ignore_index=IGNORE_INDEX):
    logp = jax.nn.log_softmax(logits_nchw.astype(jnp.float32), axis=1)
    N, C, H, W = logits_nchw.shape
    logp = jnp.transpose(logp, (0, 2, 3, 1)).reshape(-1, C)
    t = target_nhw.reshape(-1)
    picked = jnp.take_along_axis(logp, t[:, None], axis=1)[:, 0]
    valid = (t != ignore_index).astype(jnp.float32)
    return jnp.sum(-picked * valid) / jnp.sum(valid)


if __name__ == "__main__":
    key = jax.random.PRNGKey(0)
    kx, kt = jax.random.split(key)

    N, C, H, W = 2, 4, 16, 16
    logits = jax.random.normal(kx, (N, C, H, W), dtype=jnp.float32)
    target = jax.random.randint(kt, (N, H, W), 0, C, dtype=jnp.int32)

    loss = jax.block_until_ready(cross_entropy_loss_2d(logits, target))
    ref = jax.block_until_ready(_reference(logits, target))
    assert jnp.allclose(loss, ref, rtol=1e-5, atol=1e-5), (loss, ref)

    # Also exercise a multi-tile / split-axis configuration (forces S=2 and
    # tail masking) to make sure the accumulate-and-reduce path is correct.
    loss2 = jax.block_until_ready(
        cross_entropy_loss_2d(logits, target, tile_hw=128))
    assert jnp.allclose(loss2, ref, rtol=1e-5, atol=1e-5), (loss2, ref)

    print("KERNEL_OK")
</pallas_src>

<mosaic_0001>
module attributes {stable_mosaic.version = 11 : i64} {
  func.func @_ce_kernel(%arg0: i32, %arg1: i32, %arg2: i32, %arg3: memref<1x4x256xf32, #tpu.memory_space<vmem>>, %arg4: memref<1x1x256xi32, #tpu.memory_space<vmem>>, %arg5: memref<1x1x1x128xf32, #tpu.memory_space<vmem>>, %arg6: memref<1x1x1x128xf32, #tpu.memory_space<vmem>>, %arg7: memref<1x1x256xf32, #tpu.memory_space<vmem>>, %arg8: memref<1x1x256xf32, #tpu.memory_space<vmem>>) attributes {dimension_semantics = [#tpu.dimension_semantics<parallel>, #tpu.dimension_semantics<parallel>, #tpu.dimension_semantics<arbitrary>], iteration_bounds = array<i64: 2, 1, 1>, scalar_prefetch = 0 : i64, scratch_operands = 2 : i64, tpu.core_type = #tpu.core_type<tc>, window_params = [{transform_indices = @transform_0, window_bounds = array<i64: 1, 4, 256>}, {transform_indices = @transform_1, window_bounds = array<i64: 1, 1, 256>}, {transform_indices = @transform_2, window_bounds = array<i64: 1, 1, 1, 128>}, {transform_indices = @transform_3, window_bounds = array<i64: 1, 1, 1, 128>}]} {
    %c0_i32 = arith.constant 0 : i32
    %0 = arith.cmpi eq, %arg2, %c0_i32 : i32
    %1 = arith.extui %0 : i1 to i32
    %c0_i32_0 = arith.constant 0 : i32
    %2 = arith.cmpi ne, %1, %c0_i32_0 : i32
    scf.if %2 {
      %cst_26 = arith.constant 0.000000e+00 : f32
      %45 = vector.broadcast %cst_26 : f32 to vector<1x1x256xf32>
      %c0_27 = arith.constant 0 : index
      %c0_28 = arith.constant 0 : index
      %c0_29 = arith.constant 0 : index
      %46 = vector.load %arg7[%c0_27, %c0_28, %c0_29] : memref<1x1x256xf32, #tpu.memory_space<vmem>>, vector<1x1x256xf32>
      tpu.vector_store %arg7[%c0_27, %c0_28, %c0_29], %45 {strides = array<i32>} : memref<1x1x256xf32, #tpu.memory_space<vmem>>, vector<1x1x256xf32>,
      %cst_30 = arith.constant 0.000000e+00 : f32
      %47 = vector.broadcast %cst_30 : f32 to vector<1x1x256xf32>
      %c0_31 = arith.constant 0 : index
      %c0_32 = arith.constant 0 : index
      %c0_33 = arith.constant 0 : index
      %48 = vector.load %arg8[%c0_31, %c0_32, %c0_33] : memref<1x1x256xf32, #tpu.memory_space<vmem>>, vector<1x1x256xf32>
      tpu.vector_store %arg8[%c0_31, %c0_32, %c0_33], %47 {strides = array<i32>} : memref<1x1x256xf32, #tpu.memory_space<vmem>>, vector<1x1x256xf32>,
    } else {
    }
    %c0 = arith.constant 0 : index
    %c0_1 = arith.constant 0 : index
    %c0_2 = arith.constant 0 : index
    %3 = vector.load %arg3[%c0, %c0_1, %c0_2] : memref<1x4x256xf32, #tpu.memory_space<vmem>>, vector<1x4x256xf32>
    %c0_3 = arith.constant 0 : index
    %c0_4 = arith.constant 0 : index
    %c0_5 = arith.constant 0 : index
    %4 = vector.load %arg4[%c0_3, %c0_4, %c0_5] : memref<1x1x256xi32, #tpu.memory_space<vmem>>, vector<1x1x256xi32>
    %5 = tpu.iota {dimensions = array<i32: 2>} : vector<1x1x256xi32>
    %c1_i32 = arith.constant 1 : i32
    %6 = arith.muli %arg1, %c1_i32 : i32
    %7 = arith.addi %6, %arg2 : i32
    %c256_i32 = arith.constant 256 : i32
    %8 = arith.muli %7, %c256_i32 : i32
    %9 = vector.broadcast %8 : i32 to vector<1x1x256xi32>
    %10 = arith.addi %9, %5 : vector<1x1x256xi32>
    %c0_i32_6 = arith.constant 0 : i32
    %11 = vector.broadcast %c0_i32_6 : i32 to vector<1x1x256xi32>
    %12 = arith.cmpi ne, %4, %11 : vector<1x1x256xi32>
    %c256_i32_7 = arith.constant 256 : i32
    %13 = vector.broadcast %c256_i32_7 : i32 to vector<1x1x256xi32>
    %14 = arith.cmpi slt, %10, %13 : vector<1x1x256xi32>
    %15 = arith.andi %12, %14 : vector<1x1x256xi1>
    %cst = arith.constant dense<0xFF800000> : vector<1x256xf32>
    %16 = vector.multi_reduction <maximumf>, %3, %cst [1] : vector<1x4x256xf32> to vector<1x256xf32>
    %17 = vector.shape_cast %16 : vector<1x256xf32> to vector<1x1x256xf32>
    %18 = vector.broadcast %17 : vector<1x1x256xf32> to vector<1x4x256xf32>
    %19 = arith.subf %3, %18 : vector<1x4x256xf32>
    %20 = math.exp %19 : vector<1x4x256xf32>
    %cst_8 = arith.constant dense<0.000000e+00> : vector<1x256xf32>
    %21 = vector.multi_reduction <add>, %20, %cst_8 [1] : vector<1x4x256xf32> to vector<1x256xf32>
    %22 = vector.shape_cast %21 : vector<1x256xf32> to vector<1x1x256xf32>
    %23 = math.log %22 : vector<1x1x256xf32>
    %24 = tpu.iota {dimensions = array<i32: 1>} : vector<1x4x256xi32>
    %25 = vector.broadcast %4 : vector<1x1x256xi32> to vector<1x4x256xi32>
    %26 = arith.cmpi eq, %24, %25 : vector<1x4x256xi32>
    %cst_9 = arith.constant 0.000000e+00 : f32
    %27 = vector.broadcast %cst_9 : f32 to vector<1x4x256xf32>
    %28 = arith.select %26, %19, %27 : vector<1x4x256xi1>, vector<1x4x256xf32>
    %cst_10 = arith.constant dense<0.000000e+00> : vector<1x256xf32>
    %29 = vector.multi_reduction <add>, %28, %cst_10 [1] : vector<1x4x256xf32> to vector<1x256xf32>
    %30 = vector.shape_cast %29 : vector<1x256xf32> to vector<1x1x256xf32>
    %c0_11 = arith.constant 0 : index
    %c0_12 = arith.constant 0 : index
    %c0_13 = arith.constant 0 : index
    %31 = vector.load %arg7[%c0_11, %c0_12, %c0_13] : memref<1x1x256xf32, #tpu.memory_space<vmem>>, vector<1x1x256xf32>
    %32 = arith.subf %23, %30 : vector<1x1x256xf32>
    %cst_14 = arith.constant 0.000000e+00 : f32
    %33 = vector.broadcast %cst_14 : f32 to vector<1x1x256xf32>
    %34 = arith.select %15, %32, %33 : vector<1x1x256xi1>, vector<1x1x256xf32>
    %35 = arith.addf %31, %34 : vector<1x1x256xf32>
    %c0_15 = arith.constant 0 : index
    %c0_16 = arith.constant 0 : index
    %c0_17 = arith.constant 0 : index
    %36 = vector.load %arg7[%c0_15, %c0_16, %c0_17] : memref<1x1x256xf32, #tpu.memory_space<vmem>>, vector<1x1x256xf32>
    tpu.vector_store %arg7[%c0_15, %c0_16, %c0_17], %35 {strides = array<i32>} : memref<1x1x256xf32, #tpu.memory_space<vmem>>, vector<1x1x256xf32>,
    %c0_18 = arith.constant 0 : index
    %c0_19 = arith.constant 0 : index
    %c0_20 = arith.constant 0 : index
    %37 = vector.load %arg8[%c0_18, %c0_19, %c0_20] : memref<1x1x256xf32, #tpu.memory_space<vmem>>, vector<1x1x256xf32>
    %38 = arith.extui %15 : vector<1x1x256xi1> to vector<1x1x256xi32>
    %39 = arith.sitofp %38 : vector<1x1x256xi32> to vector<1x1x256xf32>
    %40 = arith.addf %37, %39 : vector<1x1x256xf32>
    %c0_21 = arith.constant 0 : index
    %c0_22 = arith.constant 0 : index
    %c0_23 = arith.constant 0 : index
    %41 = vector.load %arg8[%c0_21, %c0_22, %c0_23] : memref<1x1x256xf32, #tpu.memory_space<vmem>>, vector<1x1x256xf32>
    tpu.vector_store %arg8[%c0_21, %c0_22, %c0_23], %40 {strides = array<i32>} : memref<1x1x256xf32, #tpu.memory_space<vmem>>, vector<1x1x256xf32>,
    %c0_i32_24 = arith.constant 0 : i32
    %42 = arith.cmpi eq, %arg2, %c0_i32_24 : i32
    %43 = arith.extui %42 : i1 to i32
    %c0_i32_25 = arith.constant 0 : i32
    %44 = arith.cmpi ne, %43, %c0_i32_25 : i32
    scf.if %44 {
      %c0_26 = arith.constant 0 : index
      %c0_27 = arith.constant 0 : index
      %c0_28 = arith.constant 0 : index
      %45 = vector.load %arg7[%c0_26, %c0_27, %c0_28] : memref<1x1x256xf32, #tpu.memory_space<vmem>>, vector<1x1x256xf32>
      %46 = vector.shape_cast %45 : vector<1x1x256xf32> to vector<1x1x1x256xf32>
      %cst_29 = arith.constant dense<0.000000e+00> : vector<1xf32>
      %47 = vector.multi_reduction <add>, %46, %cst_29 [1, 2, 3] : vector<1x1x1x256xf32> to vector<1xf32>
      %48 = vector.shape_cast %47 : vector<1xf32> to vector<1x1x1x1xf32>
      %49 = vector.extract %48[0, 0, 0, 0] : f32 from vector<1x1x1x1xf32>
      %50 = vector.broadcast %49 : f32 to vector<1x1x1x128xf32>
      %c0_30 = arith.constant 0 : index
      %c0_31 = arith.constant 0 : index
      %c0_32 = arith.constant 0 : index
      %c0_33 = arith.constant 0 : index
      %51 = vector.load %arg5[%c0_30, %c0_31, %c0_32, %c0_33] : memref<1x1x1x128xf32, #tpu.memory_space<vmem>>, vector<1x1x1x128xf32>
      tpu.vector_store %arg5[%c0_30, %c0_31, %c0_32, %c0_33], %50 {strides = array<i32>} : memref<1x1x1x128xf32, #tpu.memory_space<vmem>>, vector<1x1x1x128xf32>,
      %c0_34 = arith.constant 0 : index
      %c0_35 = arith.constant 0 : index
      %c0_36 = arith.constant 0 : index
      %52 = vector.load %arg8[%c0_34, %c0_35, %c0_36] : memref<1x1x256xf32, #tpu.memory_space<vmem>>, vector<1x1x256xf32>
      %53 = vector.shape_cast %52 : vector<1x1x256xf32> to vector<1x1x1x256xf32>
      %cst_37 = arith.constant dense<0.000000e+00> : vector<1xf32>
      %54 = vector.multi_reduction <add>, %53, %cst_37 [1, 2, 3] : vector<1x1x1x256xf32> to vector<1xf32>
      %55 = vector.shape_cast %54 : vector<1xf32> to vector<1x1x1x1xf32>
      %56 = vector.extract %55[0, 0, 0, 0] : f32 from vector<1x1x1x1xf32>
      %57 = vector.broadcast %56 : f32 to vector<1x1x1x128xf32>
      %c0_38 = arith.constant 0 : index
      %c0_39 = arith.constant 0 : index
      %c0_40 = arith.constant 0 : index
      %c0_41 = arith.constant 0 : index
      %58 = vector.load %arg6[%c0_38, %c0_39, %c0_40, %c0_41] : memref<1x1x1x128xf32, #tpu.memory_space<vmem>>, vector<1x1x1x128xf32>
      tpu.vector_store %arg6[%c0_38, %c0_39, %c0_40, %c0_41], %57 {strides = array<i32>} : memref<1x1x1x128xf32, #tpu.memory_space<vmem>>, vector<1x1x1x128xf32>,
    } else {
    }
    return
  }
  func.func @transform_0(%arg0: i32, %arg1: i32, %arg2: i32) -> (i32, i32, i32) {
    %c1_i32 = arith.constant 1 : i32
    %0 = arith.muli %arg1, %c1_i32 : i32
    %1 = arith.addi %0, %arg2 : i32
    %c0_i32 = arith.constant 0 : i32
    %2 = arith.minsi %1, %c0_i32 : i32
    %c0_i32_0 = arith.constant 0 : i32
    %c0_i32_1 = arith.constant 0 : i32
    return %arg0, %c0_i32_0, %2 : i32, i32, i32
  }
  func.func @transform_1(%arg0: i32, %arg1: i32, %arg2: i32) -> (i32, i32, i32) {
    %c1_i32 = arith.constant 1 : i32
    %0 = arith.muli %arg1, %c1_i32 : i32
    %1 = arith.addi %0, %arg2 : i32
    %c0_i32 = arith.constant 0 : i32
    %2 = arith.minsi %1, %c0_i32 : i32
    %c0_i32_0 = arith.constant 0 : i32
    %c0_i32_1 = arith.constant 0 : i32
    return %arg0, %c0_i32_0, %2 : i32, i32, i32
  }
  func.func @transform_2(%arg0: i32, %arg1: i32, %arg2: i32) -> (i32, i32, i32, i32) {
    %c0_i32 = arith.constant 0 : i32
    %c0_i32_0 = arith.constant 0 : i32
    %c0_i32_1 = arith.constant 0 : i32
    return %arg0, %arg1, %c0_i32, %c0_i32_0 : i32, i32, i32, i32
  }
  func.func @transform_3(%arg0: i32, %arg1: i32, %arg2: i32) -> (i32, i32, i32, i32) {
    %c0_i32 = arith.constant 0 : i32
    %c0_i32_0 = arith.constant 0 : i32
    %c0_i32_1 = arith.constant 0 : i32
    return %arg0, %arg1, %c0_i32, %c0_i32_0 : i32, i32, i32, i32
  }
}

</mosaic_0001>

<bundles_post_ra>
// kernel: tpu_custom_call.1
= control target key start
LH: loop header
LB: loop body
LE: loop exit
PB: predicated region body
PF: predicated region fallthrough
CT: control target
= control target key end

     0   :  { %9 = vsyncpa [#allocation5], 0  ;;  %s1222_s0 = inlined_call_operand.hbm [shape: f32[2,4,256], index: 0, kind: input, shape index: {}]   ;;  %s1223_s1 = inlined_call_operand.hbm [shape: s32[2,1,256], index: 1, kind: input, shape index: {}]   ;;  %s1224_s2 = inlined_call_operand.hbm [shape: f32[2,1,1,128], index: 2, kind: output, shape index: {0}]   ;;  %s1225_s3 = inlined_call_operand.hbm [shape: f32[2,1,1,128], index: 3, kind: output, shape index: {1}]  }
   0x1   :  { %11 = vsyncpa [#allocation5 + $0x1], 0 }
   0x2   :  { %12 = vsyncpa [#allocation8], 0 }
   0x3   :  { %14 = vsyncpa [#allocation8 + $0x1], 0 }
   0x4   :  { %15 = vsyncpa [#allocation6], 0 }
   0x5   :  { %17 = vsyncpa [#allocation6 + $0x1], 0 }
   0x6   :  { %18 = vsyncpa [#allocation11], 0 }
   0x7   :  { %20 = vsyncpa [#allocation11 + $0x1], 0  ;;  %s972_s12 = smov 0   ;;  %s974_s13 = smov 0  }
   0x8   :  { %s976_s14 = smov 0   ;;  %s978_s15 = smov 0  }
   0x9   :  { %s980_s16 = smov 0   ;;  %s982_s17 = smov 0  }
   0xa LB: > { %s667_s18 = sadd.s32 4294967295, %s943_s17   ;;  %s668_s19 = sadd.s32 4294967294, %s943_s17   ;;  %s943_s17 = sphi %s982_s17, %s26_s17   ;;  %s939_s16 = sphi %s980_s16, %s1241_s16   ;;  %s935_s15 = sphi %s978_s15, %s1240_s15   ;;  %s931_s14 = sphi %s976_s14, %s1239_s14   ;;  %s927_s13 = sphi %s974_s13, %s1238_s13   ;;  %s923_s12 = sphi %s972_s12, %s1237_s12  }
   0xb   : > { %s45_s20 = sadd.s32 1, %s939_s16  ;;  %s60_s21 = sadd.s32 1, %s931_s14 }
   0xc   : > { %p47_p0 = scmp.ge.s32.totalorder %s45_s20, 2  ;;  %p67_p1 = scmp.ne.s32.totalorder %s931_s14, %s927_s13 }
   0xd   : > { %p68_p2 = scmp.eq.s32.totalorder %s943_s17, 0  ;;  %p73_p3 = scmp.ne.s32.totalorder %s927_s13, %s923_s12 }
   0xe   : > { %s1243_s20 = smov (%p47_p0, %s45_s20), 0  ;;  %p74_p5 = scmp.eq.s32.totalorder %s667_s18, 0 }
   0xf   : > { %p1013_p4 = por %p68_p2, %p67_p1  ;;  %s55_s23 = ssub.s32 %s939_s16, %s1243_s20 }
  0x10   : > { %p133_p6 = scmp.eq.s32.totalorder %s667_s18, 1  ;;  %p58_p7 = scmp.eq.s32.totalorder %s55_s23, 0 }
  0x11   : > { %p1019_p8 = por %p74_p5, %p73_p3  ;;  %p139_p10 = scmp.eq.s32.totalorder %s668_s19, 1 }
  0x12   : > { %p1023_p9 = por %p133_p6, %p67_p1  ;;  %p713_p13 = scmp.lt.s32.totalorder %s943_s17, 2 }
  0x13   : > { %s1028_s26 = scalar_select %p58_p7, %s931_s14, %s60_s21  }
  0x14   : > { %p1030_p11 = por %p139_p10, %p73_p3  ;;  %s1037_s28 = sand.u32 1, %s931_s14  }
  0x15   : > { %s671_s29 = sshll.u32 %s1037_s28, 3  ;;  %s685_s30 = sshll.u32 %s939_s16, 7 }
  0x16   : > { %s202_s6 = scalar_lea.hbm %s1222_s0, %s685_s30  ;;  %s191_s7 = scalar_lea.vmem [#allocation4], %s671_s29 }
  0x17   : > { %s204_s8 = sshll.u32 %s191_s7, 4  ;;  %p1046_p0 = pnand %p713_p13, %p1013_p4  ;;  %s205_s8 = int_to_ptr.vmem [resolvable:$true] %s204_s8 }
  0x18   : > { %p677_p1 = scmp.ge.s32.totalorder %s943_s17, 1  ;;  %p233_p2 = scmp.lt.s32.totalorder %s943_s17, 3 }
  0x19   : > { %s188_s10 = scalar_lea.sflag [#allocation5], %s1037_s28  ;;  %p775_p3 = pneg %p1046_p0 }
  0x1a   : > { %s786_s11 = scalar_lea.vmem %s205_s8, 128  ;;  %s945_s18 = smov [#allocation4]  }
  0x1b   : > { %p787_p5 = scmp.ne.s32.totalorder %s205_s8, %s786_s11  ;;  %s791_s19 = sshll.u32 %s945_s18, 4  ;;  %s792_s19 = int_to_ptr.vmem [resolvable:$false] %s791_s19 }
  0x1c   : > { %s793_s21 = scalar_lea.vmem %s792_s19, 256  ;;  %p794_p4 = scmp.lt.s32.totalorder %s205_s8, %s792_s19 }
  0x1d   : > { %p789_p6 = pnand %p787_p5, %p775_p3  ;;  %p795_p10 = scmp.lt.s32.totalorder %s793_s21, %s786_s11 }
  0x1f   : > { %p790_p7 = pneg %p789_p6  ;;  %p796_p13 = por %p795_p10, %p794_p4 }
  0x21   : > { %p797_p12 = pnand %p796_p13, %p790_p7 }
  0x23   : > { %800 = shalt.err (!%p797_p12)
}
  0x24   : > { %702 = dma.hbm_to_vmem [thread:$0]  (!%p1046_p0), %s202_s6, 128, %s205_s8, %s188_s10  }
  0x25   : > { %p1064_p5 = pnand %p677_p1, %p233_p2  ;;  %s674_s23 = sshll.u32 %s1037_s28, 1 }
  0x26   : > { %s686_s29 = sshll.u32 %s939_s16, 5  ;;  %s215_s7 = scalar_lea.vmem [#allocation7], %s674_s23 }
  0x27   : > { %s226_s5 = scalar_lea.hbm %s1223_s1, %s686_s29  ;;  %s228_s11 = sshll.u32 %s215_s7, 4  ;;  %s229_s11 = int_to_ptr.vmem [resolvable:$true] %s228_s11 }
  0x28   : > { %s212_s18 = scalar_lea.sflag [#allocation8], %s1037_s28  ;;  %s814_s19 = scalar_lea.vmem %s229_s11, 32 }
  0x29   : > { %p815_p12 = scmp.ne.s32.totalorder %s229_s11, %s814_s19  ;;  %s946_s6 = smov [#allocation7]  }
  0x2a   : > { %s819_s8 = sshll.u32 %s946_s6, 4  ;;  %s820_s8 = int_to_ptr.vmem [resolvable:$false] %s819_s8 }
  0x2b   : > { %p817_p6 = pnand %p815_p12, %p775_p3  ;;  %s821_s10 = scalar_lea.vmem %s820_s8, 64 }
  0x2c   : > { %p822_p1 = scmp.lt.s32.totalorder %s229_s11, %s820_s8  ;;  %p823_p2 = scmp.lt.s32.totalorder %s821_s10, %s814_s19 }
  0x2d   : > { %p818_p7 = pneg %p817_p6 }
  0x2e   : > { %p824_p4 = por %p823_p2, %p822_p1 }
  0x30   : > { %p825_p10 = pnand %p824_p4, %p818_p7 }
  0x32   : > { %828 = shalt.err (!%p825_p10)
}
  0x33   : > { %705 = dma.hbm_to_vmem [thread:$0]  (!%p1046_p0), %s226_s5, 32, %s229_s11, %s212_s18  }
  0x34   : > { %237 = sbr.rel (%p1064_p5) target bundleno = 389 (0x185), region = 28  ;;  %s1082_s28 = sand.u32 (!%p1064_p5), 1, %s927_s13  }
  0x35   : > { %s678_s21 = sshll.u32 (!%p1064_p5), %s1082_s28, 3  ;;  %s240_s23 = scalar_lea.sflag (!%p1064_p5), [#allocation5], %s1082_s28 }
  0x36   : > { %s243_s29 = scalar_lea.vmem (!%p1064_p5), [#allocation4], %s678_s21 }
  0x39   : > { %906 = dma.done.wait (%p1019_p8), %s240_s23, 128  }
  0x3a   : > { %908 = vsyncadd (%p1019_p8), %s240_s23, 4294967168  ;;  %s679_s9 = sshll.u32 %s1082_s28, 1  ;;  %s249_s22 = scalar_lea.sflag [#allocation8], %s1082_s28 }
  0x3b   : > { %s252_s30 = scalar_lea.vmem [#allocation7], %s679_s9 }
  0x3c   : > { %910 = dma.done.wait (%p1019_p8), %s249_s22, 32  }
  0x3d   : > { %912 = vsyncadd (%p1019_p8), %s249_s22, 4294967264  ;;  %v295_v0 = vlaneseq  ;;  %v947_v1 = vmov 1966171168   ;;  %v948_v4 = vmov 0.0   ;;  %v949_v5 = vmov 1   ;;  %v301_v10 = vld [vmem:[%s243_s29] sm:$0xff] }
  0x3e   : > { %v318_v2 = vunpack.c.l.s4 %v947_v1  ;;  %v316_v6 = vcombine.low %v949_v5, %v949_v5  ;;  %vm336_vm1 = vcmask 1043456   ;;  %v302_v12 = vld [vmem:[%s252_s30] sm:$0x3]  ;;  %v334_v13 = vcombine.high %v301_v10, %v301_v10  ;;  %s681_s24 = sshll.u32 %s935_s15, 4  ;;  %s276_s4 = scalar_lea.vmem [#allocation9], %s1082_s28 }
  0x3f   : > { %vm1096_vm0 = vcmp.lt.s32.totalorder %v295_v0, 256  ;;  %v321_v8 = vshrl.u32 %v295_v0, 7  ;;  %v337_v14 = vsel %vm336_vm1, %v301_v10, -inf  ;;  %vm311_vm2 = vcmp.ne.s32.totalorder %v302_v12, 0  ;;  %s517_s5 = sshll.u32 %s276_s4, 4  ;;  %s282_s7 = scalar_lea.vmem [#allocation10], %s1082_s28  ;;  %s1150_s5 = int_to_ptr.vmem [resolvable:$true] %s517_s5 }
  0x40   : > { %299 = vst.msk [vmem:[#allocation2] sm:$0x3] %vm1096_vm0, %v948_v4  ;;  %300 = vst.msk [vmem:[#allocation3] sm:$0x3] %vm1096_vm0, %v948_v4  ;;  %v319_v7 = vunpack.c.0.s8 %v318_v2  ;;  %v338_v16 = vrot.slane %v337_v14, 4  ;;  %v344_v17 = vsel %vm336_vm1, %v334_v13, -inf  ;;  %s1148_s6 = scalar_lea.hbm %s1224_s2, %s681_s24 }
  0x41   : > { %v345_v19 = vrot.slane %v344_v17, 4  ;;  %v1118_v36 = vsub.s32 0, %v321_v8  ;;  %v1120_v37 = vsub.s32 1, %v321_v8  ;;  %vm458_vm7 = vcmask 1040384   ;;  %s531_s11 = sshll.u32 %s282_s7, 4  ;;  %s500_s10 = scalar_lea.sflag [#allocation6], %s1082_s28  ;;  %s1152_s11 = int_to_ptr.vmem [resolvable:$true] %s531_s11 }
  0x42   : > { %v1104_v9 = vsub.s32 %v319_v7, %v321_v8  ;;  %v339_v18 = vmax.f32 %v337_v14, %v338_v16  ;;  %s829_s21 = scalar_lea.vmem %s1150_s5, 16  ;;  %s950_s23 = smov [#allocation9]  }
  0x43   : > { %v346_v23 = vmax.f32 %v344_v17, %v345_v19  ;;  %v384_v38 = vrot.slane %v302_v12, %v1118_v36  ;;  %v388_v39 = vrot.slane %v302_v12, %v1120_v37  ;;  %p830_p8 = scmp.ne.s32.totalorder %s1150_s5, %s829_s21  ;;  %s833_s29 = sshll.u32 %s950_s23, 4  ;;  %s834_s29 = int_to_ptr.vmem [resolvable:$false] %s833_s29 }
  0x44   : > { %v323_v11 = vrot.slane %v316_v6, %v1104_v9  ;;  %v340_v22 = vrot.slane %v339_v18, 2  ;;  %s835_s9 = scalar_lea.vmem %s834_s29, 32  ;;  %p836_p13 = scmp.lt.s32.totalorder %s1150_s5, %s834_s29 }
  0x45   : > { %v347_v27 = vrot.slane %v346_v23, 2  ;;  %vm389_vm5 = vcmp.eq.s32.totalorder %v321_v8, %v384_v38  ;;  %vm390_vm6 = vcmp.eq.s32.totalorder %v321_v8, %v388_v39  ;;  %p831_p0 = pnand %p830_p8, %p1023_p9  ;;  %p837_p5 = scmp.lt.s32.totalorder %s835_s9, %s829_s21 }
  0x46   : > { %v330_v15 = vrot.slane %v323_v11, %v1104_v9  ;;  %v341_v26 = vmax.f32 %v339_v18, %v340_v22 }
  0x47   : > { %v438_v20 = vld [vmem:[#allocation3] sm:$0x3]  ;;  %v348_v29 = vmax.f32 %v346_v23, %v347_v27  ;;  %v410_v19 = vld [vmem:[#allocation2] sm:$0x3]  ;;  %p832_p3 = pneg %p831_p0  ;;  %p838_p12 = por %p837_p5, %p836_p13 }
  0x48   : > { %vm331_vm3 = vcmp.ne.s32.totalorder %v330_v15, 0  ;;  %v342_v28 = vrot.slane %v341_v26, 1 }
  0x49   : > { %vm1110_vm4 = vmand %vm311_vm2, %vm331_vm3  ;;  %v349_v31 = vrot.slane %v348_v29, 1  ;;  %p839_p6 = pnand %p838_p12, %p832_p3 }
  0x4a   : > { %v680_v24 = vsel %vm1110_vm4, 1.0, %v948_v4  ;;  %v343_v30 = vmax.f32 %v341_v26, %v342_v28 }
  0x4b   : > { %v441_v25 = vadd.f32 %v680_v24, %v438_v20  ;;  %v350_v32 = vmax.f32 %v348_v29, %v349_v31 }
  0x4d   : > { %442 = vst.msk [vmem:[#allocation3] sm:$0x3] %vm1096_vm0, %v441_v25  ;;  %v353_v33 = vcombine.low %v343_v30, %v350_v32 }
  0x4f   : > { %v355_v34 = vsub.f32 %v301_v10, %v353_v33 }
  0x51   : > { %v356_v35 = vmul.f32 1.442695, %v355_v34  ;;  %v392_v40 = vcombine.high %v355_v34, %v355_v34  ;;  %v394_v42 = vsel %vm389_vm5, %v355_v34, 0.0 }
  0x52   : > { %v396_v48 = vsel %vm336_vm1, %v394_v42, 0.0 }
  0x53   : > { %767 = vpow2.f32 %v356_v35  ;;  %v395_v46 = vsel %vm390_vm6, %v392_v40, 0.0  ;;  %v397_v54 = vrot.slane %v396_v48, 4 }
  0x54   : > { %v403_v51 = vsel %vm336_vm1, %v395_v46, 0.0  ;;  %v473_v24 = vld [vmem:[#allocation3] sm:$0x3] }
  0x55   : > { %v404_v57 = vrot.slane %v403_v51, 4  ;;  %v398_v60 = vadd.f32 %v397_v54, %v396_v48  ;;  %v478_v25 = vrot.slane %v473_v24, %v1118_v36  ;;  %v482_v26 = vrot.slane %v473_v24, %v1120_v37 }
  0x57   : > { %v405_v63 = vadd.f32 %v404_v57, %v403_v51  ;;  %v399_v1 = vrot.slane %v398_v60, 2  ;;  %v485_v31 = vsel %vm458_vm7, %v478_v25, 0.0  ;;  %v486_v21 = vsel %vm458_vm7, %v482_v26, 0.0 }
  0x58   : > { %v487_v33 = vadd.f32 %v486_v21, %v485_v31 }
  0x59   : > { %v406_v2 = vrot.slane %v405_v63, 2  ;;  %v400_v4 = vadd.f32 %v399_v1, %v398_v60 }
  0x5b   : > { %v407_v5 = vadd.f32 %v406_v2, %v405_v63  ;;  %v401_v6 = vrot.slane %v400_v4, 1 }
  0x5d   : > { %v408_v7 = vrot.slane %v407_v5, 1  ;;  %v402_v8 = vadd.f32 %v401_v6, %v400_v4 }
  0x5f   : > { %v409_v12 = vadd.f32 %v408_v7, %v407_v5 }
  0x60   : > { %v768_v41 = vpop.eup %767 }
  0x61   : > { %v359_v43 = vcombine.high %v768_v41, %v768_v41  ;;  %v361_v44 = vsel %vm336_vm1, %v768_v41, 0.0 }
  0x62   : > { %v362_v45 = vrot.slane %v361_v44, 4 }
  0x63   : > { %v368_v47 = vsel %vm336_vm1, %v359_v43, 0.0 }
  0x64   : > { %v363_v49 = vadd.f32 %v362_v45, %v361_v44  ;;  %v369_v50 = vrot.slane %v368_v47, 4 }
  0x66   : > { %v364_v52 = vrot.slane %v363_v49, 2  ;;  %v370_v53 = vadd.f32 %v369_v50, %v368_v47 }
  0x68   : > { %v365_v55 = vadd.f32 %v364_v52, %v363_v49  ;;  %v371_v56 = vrot.slane %v370_v53, 2 }
  0x6a   : > { %v366_v58 = vrot.slane %v365_v55, 1  ;;  %v372_v59 = vadd.f32 %v371_v56, %v370_v53 }
  0x6c   : > { %v367_v61 = vadd.f32 %v366_v58, %v365_v55  ;;  %v373_v62 = vrot.slane %v372_v59, 1 }
  0x6e   : > { %v374_v0 = vadd.f32 %v373_v62, %v372_v59  ;;  %769 = vlog2.f32 %v367_v61 }
  0x70   : > { %771 = vlog2.f32 %v374_v0 }
  0x7b   : > { %v770_v10 = vpop.eup %769 }
  0x7c   : > { %v376_v11 = vmul.f32 0.6931472, %v770_v10 }
  0x7d   : > { %v772_v13 = vpop.eup %771 }
  0x7e   : > { %v378_v14 = vmul.f32 0.6931472, %v772_v13  ;;  %v411_v15 = vsub.f32 %v376_v11, %v402_v8 }
  0x80   : > { %v412_v16 = vsub.f32 %v378_v14, %v409_v12 }
  0x82   : > { %v415_v17 = vcombine.low %v411_v15, %v412_v16 }
  0x84   : > { %v422_v18 = vrot.slane %v415_v17, %v1104_v9 }
  0x86   : > { %v429_v20 = vrot.slane %v422_v18, %v1104_v9 }
  0x88   : > { %v431_v22 = vsel %vm1110_vm4, %v429_v20, 0.0 }
  0x89   : > { %v432_v23 = vadd.f32 %v431_v22, %v410_v19 }
  0x8b   : > { %437 = vst.msk [vmem:[#allocation2] sm:$0x3] %vm1096_vm0, %v432_v23 }
  0x92   : > { %v446_v27 = vld [vmem:[#allocation2] sm:$0x3] }
  0x93   : > { %v451_v28 = vrot.slane %v446_v27, %v1118_v36  ;;  %v455_v29 = vrot.slane %v446_v27, %v1120_v37 }
  0x95   : > { %v459_v30 = vsel %vm458_vm7, %v451_v28, 0.0  ;;  %v460_v9 = vsel %vm458_vm7, %v455_v29, 0.0 }
  0x96   : > { %v461_v32 = vadd.f32 %v460_v9, %v459_v30 }
  0x98   : > { %462 = vadd.xlane.f32.xlu0 %v461_v32 }
  0x9c   : > { %488 = vadd.xlane.f32.xlu0 %v487_v33 }
 0x121   : > { %v463_v3 = vpop.xlane.xlu0 %462 }
 0x122   : > { %v464_v34 = vrot.slane %v463_v3, 4 }
 0x124   : > { %v465_v35 = vadd.f32 %v464_v34, %v463_v3 }
 0x125   : > { %v489_v38 = vpop.xlane.xlu0 %488 }
 0x126   : > { %v466_v39 = vrot.slane %v465_v35, 2  ;;  %v490_v36 = vrot.slane %v489_v38, 4 }
 0x128   : > { %v491_v37 = vadd.f32 %v490_v36, %v489_v38  ;;  %v467_v40 = vadd.f32 %v466_v39, %v465_v35 }
 0x12a   : > { %v492_v41 = vrot.slane %v491_v37, 2  ;;  %v468_v42 = vrot.slane %v467_v40, 1 }
 0x12c   : > { %v493_v43 = vadd.f32 %v492_v41, %v491_v37  ;;  %v469_v44 = vadd.f32 %v468_v42, %v467_v40 }
 0x12e   : > { %687 = vpush %v469_v44  ;;  %v494_v45 = vrot.slane %v493_v43, 1 }
 0x130   : > { %v495_v46 = vadd.f32 %v494_v45, %v493_v43 }
 0x132   : > { %689 = vpush %v495_v46 }
 0x15f   : > { %s688_s8 = spop %687 }
 0x160   : > { %v471_v47 = vstv %s688_s8 }
 0x161   : > { %472 = vst [vmem:[%s276_s4] sm:$0x1] %v471_v47 }
 0x162   : > { %842 = shalt.err (!%p839_p6)
}
 0x163   : > { %s843_s22 = scalar_lea.hbm %s1148_s6, 16  ;;  %s847_s18 = scalar_lea.hbm %s1224_s2, 32 }
 0x164   : > { %p844_p7 = scmp.ne.s32.totalorder %s1148_s6, %s843_s22  ;;  %p848_p4 = scmp.lt.s32.totalorder %s1148_s6, %s1224_s2 }
 0x165   : > { %p849_p10 = scmp.lt.s32.totalorder %s847_s18, %s843_s22 }
 0x166   : > { %p845_p1 = pnand %p844_p7, %p1023_p9 }
 0x167   : > { %p850_p8 = por %p849_p10, %p848_p4 }
 0x168   : > { %p846_p2 = pneg %p845_p1 }
 0x16a   : > { %p851_p0 = pnand %p850_p8, %p846_p2 }
 0x16c   : > { %854 = shalt.err (!%p851_p0)
}
 0x16d   : > { %695 = dma.vmem_to_hbm [thread:$0]  (%p1023_p9), %s1150_s5, 16, %s1148_s6, %s500_s10  }
 0x16e   : > { %s690_s21 = spop %689  ;;  %s529_s9 = scalar_lea.hbm %s1225_s3, %s681_s24 }
 0x16f   : > { %v497_v48 = vstv %s690_s21  ;;  %s504_s22 = scalar_lea.sflag [#allocation11], %s1082_s28  ;;  %s855_s30 = scalar_lea.vmem %s1152_s11, 16 }
 0x170   : > { %498 = vst [vmem:[%s282_s7] sm:$0x1] %v497_v48  ;;  %p856_p3 = scmp.ne.s32.totalorder %s1152_s11, %s855_s30  ;;  %s951_s4 = smov [#allocation10]  }
 0x171   : > { %s859_s18 = sshll.u32 %s951_s4, 4  ;;  %s860_s18 = int_to_ptr.vmem [resolvable:$false] %s859_s18 }
 0x172   : > { %p857_p13 = pnand %p856_p3, %p1023_p9  ;;  %s861_s19 = scalar_lea.vmem %s860_s18, 32 }
 0x173   : > { %p862_p12 = scmp.lt.s32.totalorder %s1152_s11, %s860_s18  ;;  %p863_p6 = scmp.lt.s32.totalorder %s861_s19, %s855_s30 }
 0x174   : > { %p858_p5 = pneg %p857_p13 }
 0x175   : > { %p864_p7 = por %p863_p6, %p862_p12 }
 0x177   : > { %p865_p1 = pnand %p864_p7, %p858_p5 }
 0x179   : > { %868 = shalt.err (!%p865_p1)
}
 0x17a   : > { %s869_s15 = scalar_lea.hbm %s529_s9, 16  ;;  %s873_s5 = scalar_lea.hbm %s1225_s3, 32 }
 0x17b   : > { %p870_p2 = scmp.ne.s32.totalorder %s529_s9, %s869_s15  ;;  %p874_p8 = scmp.lt.s32.totalorder %s529_s9, %s1225_s3 }
 0x17c   : > { %p875_p0 = scmp.lt.s32.totalorder %s873_s5, %s869_s15 }
 0x17d   : > { %p871_p4 = pnand %p870_p2, %p1023_p9 }
 0x17e   : > { %p876_p3 = por %p875_p0, %p874_p8 }
 0x17f   : > { %p872_p10 = pneg %p871_p4 }
 0x181   : > { %p877_p13 = pnand %p876_p3, %p872_p10 }
 0x183   : > { %880 = shalt.err (!%p877_p13)
}
 0x184   : > { %696 = dma.vmem_to_hbm [thread:$0]  (%p1023_p9), %s1152_s11, 16, %s529_s9, %s504_s22  }
 0x185 PF: > { %s543_s10 = sand.u32 1, %s923_s12   ;;  %p1236_p5 = scmp.ge.s32.totalorder %s943_s17, 2 }
 0x186   : > { %s544_s8 = scalar_lea.sflag [#allocation6], %s543_s10 }
 0x187   : > { %p707_p12 = pnand %p1236_p5, %p1030_p11 }
 0x189   : > { %p708_p6 = pneg %p707_p12 }
 0x18b   : > { %914 = dma.done.wait (%p708_p6), %s544_s8, 16  }
 0x18c   : > { %916 = vsyncadd (%p708_p6), %s544_s8, 4294967280  ;;  %s552_s21 = scalar_lea.sflag [#allocation11], %s543_s10 }
 0x18d   : > { %918 = dma.done.wait (%p708_p6), %s552_s21, 16  }
 0x18e   : > { %920 = vsyncadd (%p708_p6), %s552_s21, 4294967280  ;;  %s26_s17 = sadd.s32 1, %s943_s17   ;;  %s1237_s12 = smov %s927_s13 }
 0x18f   : > { %p23_p7 = scmp.ge.s32.totalorder %s26_s17, 4   ;;  %s1238_s13 = smov %s931_s14 }
 0x190   : > { %s1239_s14 = smov %s1028_s26  ;;  %s1240_s15 = smov %s939_s16 }
 0x191   : > { %s1241_s16 = smov %s1243_s20  ;;  %25 = sbr.rel (!%p23_p7) target bundleno = 10 (0xa), region = 111 }
 0x196   :  { %556 = vsyncpa [#allocation5], 1 }
 0x197   :  { %558 = vsyncpa [#allocation5 + $0x1], 1 }
 0x198   :  { %559 = vsyncpa [#allocation8], 1 }
 0x199   :  { %561 = vsyncpa [#allocation8 + $0x1], 1 }
 0x19a   :  { %562 = vsyncpa [#allocation6], 1 }
 0x19b   :  { %564 = vsyncpa [#allocation6 + $0x1], 1 }
 0x19c   :  { %565 = vsyncpa [#allocation11], 1 }
 0x19d   :  { %567 = vsyncpa [#allocation11 + $0x1], 1 }

</bundles_post_ra>
